<compile_context>
chip_gen: v7x
topology: tpu7x:2x2x1
jax: 0.10.0
libtpu: 0.0.40
codegen_flags: <defaults>
</compile_context>

<pallas_src>
import functools

import jax
import jax.numpy as jnp
from jax.experimental import pallas as pl
from jax.experimental.pallas import tpu as pltpu


def _char_decoder_kernel(ids_ref, h0_ref, c0_ref, wg_ref, whh_ref, b_ref,
                         wproj_ref, bproj_ref,
                         scores_ref, hT_ref, cT_ref,
                         xw_scr, h_all_scr,
                         *, seq_len, block_batch, hidden_size):
    """One batch block: fused embedding+input projection -> unrolled LSTM ->
    fused, lane-dense output projection."""
    L, Bb, H = seq_len, block_batch, hidden_size
    Vemb = wg_ref.shape[0]                                        # padded vocab

    # --- Fused embedding gather + input projection (hoisted, one MXU pass) ---
    # one_hot(ids) @ (emb @ W_ih_scaled): exact row selection, no HBM slab.
    ids = ids_ref[...]                                            # (L*Bb, 1) i32
    onehot = (jax.lax.broadcasted_iota(jnp.int32, (L * Bb, Vemb), 1)
              == ids).astype(jnp.float32)                         # (L*Bb, Vemb)
    xw_scr[...] = (jnp.dot(onehot, wg_ref[...],
                           preferred_element_type=jnp.float32)
                   + b_ref[...])                                  # (L*Bb, 4H)

    whh = whh_ref[...]                                            # (H, 4H)
    h = h0_ref[...]                                               # (Bb, H)
    c = c0_ref[...]                                               # (Bb, H)

    # --- Recurrence, fully unrolled (L small & static). Only h @ W_hh and the
    # two tanh passes remain on the serial critical path.
    # TODO(synk): at realistic shapes hold W_hh in MXU weight registers across
    # the loop via pltpu.matmul_push_rhs / matmul_acc_lhs / matmul_pop.
    for t in range(L):
        gates = (xw_scr[pl.ds(t * Bb, Bb), :]
                 + jnp.dot(h, whh, preferred_element_type=jnp.float32))
        # i/f/o columns were pre-scaled by 0.5 offline, so a single tanh pass
        # gives sigmoid via 0.5*tanh(x/2) + 0.5 (exact identity).
        tnh = jnp.tanh(gates)                                     # (Bb, 4H)
        i_g = 0.5 * tnh[:, 0 * H:1 * H] + 0.5
        f_g = 0.5 * tnh[:, 1 * H:2 * H] + 0.5
        g_g = tnh[:, 2 * H:3 * H]
        o_g = 0.5 * tnh[:, 3 * H:4 * H] + 0.5
        c = f_g * c + i_g * g_g
        h = o_g * jnp.tanh(c)
        h_all_scr[pl.ds(t * Bb, Bb), :] = h                       # aligned 8-row

    # Final states written exactly once.
    hT_ref[...] = h
    cT_ref[...] = c

    # --- Fused, lane-dense output projection over all time steps ---
    scores_ref[...] = (jnp.dot(h_all_scr[...], wproj_ref[...],
                               preferred_element_type=jnp.float32)
                       + bproj_ref[...])                          # (L*Bb, Vp)


def char_decoder_forward(input_ids, dec_hidden, params):
    """Equivalent of CharDecoder.forward.

    input_ids : (L, B) int32
    dec_hidden: tuple of (1, B, H) f32 arrays (h0, c0)
    returns   : scores (L, B, V), (h_T (1,B,H), c_T (1,B,H))
    """
    emb, w_ih, w_hh, bias, w_proj, b_proj = (
        params["emb"], params["w_ih"], params["w_hh"], params["bias"],
        params["w_proj"], params["b_proj"])

    L, B = input_ids.shape
    H = w_hh.shape[0]
    V = w_proj.shape[1]
    HIGH = jax.lax.Precision.HIGHEST

    # ---- Sizes: sublane-aligned batch blocks, lane-dense vocab padding ----
    Bb = 8                                    # sublane multiple
    Bp = ((B + Bb - 1) // Bb) * Bb
    nb = Bp // Bb                             # batch-parallel grid extent
    Vp = ((V + 127) // 128) * 128             # lane-dense scores (unmasked vst)
    Vemb_p = ((emb.shape[0] + 127) // 128) * 128

    # ---- Weight-only prep (one-time param transforms, not input pre-scaling) ----
    # Pre-scale i/f/o gate columns by 0.5 -> single-tanh gate nonlinearity.
    gate_scale = jnp.concatenate(
        [jnp.full((H,), 0.5), jnp.full((H,), 0.5),
         jnp.ones((H,)), jnp.full((H,), 0.5)]).astype(jnp.float32)  # [i|f|g|o]
    w_ih_s = w_ih * gate_scale[None, :]                             # (E, 4H)
    w_hh_s = (w_hh * gate_scale[None, :])                           # (H, 4H)
    bias_s = (bias * gate_scale).reshape(1, 4 * H)                  # (1, 4H)
    # Fused embedding+input-projection table: rows = per-char gate preacts.
    emb_p = jnp.pad(emb, ((0, Vemb_p - emb.shape[0]), (0, 0)))
    w_gates = jnp.dot(emb_p, w_ih_s, precision=HIGH)                # (Vemb_p, 4H)
    # Lane-dense projection.
    w_proj_p = jnp.pad(w_proj, ((0, 0), (0, Vp - V)))               # (H, Vp)
    b_proj_p = jnp.pad(b_proj, (0, Vp - V)).reshape(1, Vp)          # (1, Vp)

    # ---- Activation prep: pad batch to Bp, batch-block-major ids ----
    ids_p = jnp.pad(input_ids.astype(jnp.int32), ((0, 0), (0, Bp - B)))  # (L,Bp)
    ids_blk = (ids_p.reshape(L, nb, Bb).transpose(1, 0, 2)
               .reshape(nb * L * Bb, 1))                            # (nb*L*Bb, 1)
    h0 = jnp.pad(dec_hidden[0][0], ((0, Bp - B), (0, 0)))           # (Bp, H)
    c0 = jnp.pad(dec_hidden[1][0], ((0, Bp - B), (0, 0)))           # (Bp, H)

    kernel = functools.partial(_char_decoder_kernel,
                               seq_len=L, block_batch=Bb, hidden_size=H)
    const = lambda j: (0, 0)                                        # resident weights
    blk = lambda j: (j, 0)                                          # per-batch-block

    scores_flat, hT_p, cT_p = pl.pallas_call(
        kernel,
        out_shape=(
            jax.ShapeDtypeStruct((nb * L * Bb, Vp), jnp.float32),
            jax.ShapeDtypeStruct((Bp, H), jnp.float32),
            jax.ShapeDtypeStruct((Bp, H), jnp.float32),
        ),
        grid_spec=pltpu.PrefetchScalarGridSpec(
            num_scalar_prefetch=0,
            grid=(nb,),                                     # batch-parallel axis
            in_specs=[
                pl.BlockSpec((L * Bb, 1), blk),             # ids
                pl.BlockSpec((Bb, H), blk),                 # h0
                pl.BlockSpec((Bb, H), blk),                 # c0
                pl.BlockSpec((Vemb_p, 4 * H), const),       # emb @ W_ih (scaled)
                pl.BlockSpec((H, 4 * H), const),            # W_hh (scaled)
                pl.BlockSpec((1, 4 * H), const),            # bias (scaled)
                pl.BlockSpec((H, Vp), const),               # W_proj (padded)
                pl.BlockSpec((1, Vp), const),               # b_proj (padded)
            ],
            out_specs=(
                pl.BlockSpec((L * Bb, Vp), blk),            # scores (lane-dense)
                pl.BlockSpec((Bb, H), blk),                 # h_T
                pl.BlockSpec((Bb, H), blk),                 # c_T
            ),
            scratch_shapes=[
                pltpu.VMEM((L * Bb, 4 * H), jnp.float32),   # xw staging
                pltpu.VMEM((L * Bb, H), jnp.float32),       # h_t history
            ]),
        compiler_params=pltpu.CompilerParams(
            dimension_semantics=("parallel",),
            vmem_limit_bytes=32 * 1024 * 1024),  # budget explicitly; re-derive
                                                 # per generation at real shapes
    )(ids_blk, h0, c0, w_gates, w_hh_s, bias_s, w_proj_p, b_proj_p)

    scores = (scores_flat.reshape(nb, L, Bb, Vp).transpose(1, 0, 2, 3)
              .reshape(L, Bp, Vp)[:, :B, :V])
    return scores, (hT_p[:B][None], cT_p[:B][None])


def _reference_forward(input_ids, dec_hidden, params):
    """Pure-JAX reference (lax.scan, full-f32 matmuls) for correctness check."""
    emb, w_ih, w_hh, bias, w_proj, b_proj = (
        params["emb"], params["w_ih"], params["w_hh"], params["bias"],
        params["w_proj"], params["b_proj"])
    H = w_hh.shape[0]
    HIGH = jax.lax.Precision.HIGHEST
    char_embs = jnp.take(emb, input_ids, axis=0)

    def step(carry, x_t):
        h, c = carry
        gates = (jnp.dot(x_t, w_ih, precision=HIGH)
                 + jnp.dot(h, w_hh, precision=HIGH) + bias)
        i = jax.nn.sigmoid(gates[:, 0 * H:1 * H])
        f = jax.nn.sigmoid(gates[:, 1 * H:2 * H])
        g = jnp.tanh(gates[:, 2 * H:3 * H])
        o = jax.nn.sigmoid(gates[:, 3 * H:4 * H])
        c = f * c + i * g
        h = o * jnp.tanh(c)
        return (h, c), jnp.dot(h, w_proj, precision=HIGH) + b_proj

    (hT, cT), scores = jax.lax.scan(step, (dec_hidden[0][0], dec_hidden[1][0]),
                                    char_embs)
    return scores, (hT[None], cT[None])


if __name__ == "__main__":
    # Small shapes consistent with the module's forward():
    L, B = 8, 2            # (length, batch_size)
    H = 32                 # hidden_size
    E = 50                 # char_embedding_size
    V = 30                 # len(target_vocab.char2id)

    key = jax.random.PRNGKey(0)
    ks = jax.random.split(key, 10)
    scale = 0.1

    emb = scale * jax.random.normal(ks[0], (V, E), jnp.float32)
    emb = emb.at[0].set(0.0)  # padding_idx=0 row is zero in nn.Embedding
    params = {
        "emb": emb,
        "w_ih": scale * jax.random.normal(ks[1], (E, 4 * H), jnp.float32),
        "w_hh": scale * jax.random.normal(ks[2], (H, 4 * H), jnp.float32),
        # PyTorch has b_ih + b_hh; fold into one bias.
        "bias": scale * jax.random.normal(ks[3], (4 * H,), jnp.float32),
        "w_proj": scale * jax.random.normal(ks[4], (H, V), jnp.float32),
        "b_proj": scale * jax.random.normal(ks[5], (V,), jnp.float32),
    }

    input_ids = jax.random.randint(ks[6], (L, B), 0, V, jnp.int32)
    h0 = scale * jax.random.normal(ks[7], (1, B, H), jnp.float32)
    c0 = scale * jax.random.normal(ks[8], (1, B, H), jnp.float32)

    scores, (hT, cT) = char_decoder_forward(input_ids, (h0, c0), params)
    jax.block_until_ready((scores, hT, cT))

    ref_scores, (ref_hT, ref_cT) = _reference_forward(input_ids, (h0, c0), params)
    assert scores.shape == (L, B, V) and hT.shape == (1, B, H) and cT.shape == (1, B, H)
    assert jnp.allclose(scores, ref_scores, atol=3e-5, rtol=3e-5)
    assert jnp.allclose(hT, ref_hT, atol=3e-5, rtol=3e-5)
    assert jnp.allclose(cT, ref_cT, atol=3e-5, rtol=3e-5)

    # TODO(synk): train_forward (cross-entropy sum) and decode_greedy (Python
    # string assembly) are host-side glue around this forward kernel; for
    # decode_greedy, run several 1-step iterations inside one kernel (or keep
    # weights resident via cross-call prefetch / input_output_aliases) rather
    # than re-launching this pallas_call per decoded character.
    print("KERNEL_OK")
</pallas_src>

<mosaic_0001>
module attributes {stable_mosaic.version = 11 : i64} {
  func.func @_char_decoder_kernel(%arg0: i32, %arg1: memref<64x1xi32, #tpu.memory_space<vmem>>, %arg2: memref<8x32xf32, #tpu.memory_space<vmem>>, %arg3: memref<8x32xf32, #tpu.memory_space<vmem>>, %arg4: memref<128x128xf32, #tpu.memory_space<vmem>>, %arg5: memref<32x128xf32, #tpu.memory_space<vmem>>, %arg6: memref<1x128xf32, #tpu.memory_space<vmem>>, %arg7: memref<32x128xf32, #tpu.memory_space<vmem>>, %arg8: memref<1x128xf32, #tpu.memory_space<vmem>>, %arg9: memref<64x128xf32, #tpu.memory_space<vmem>>, %arg10: memref<8x32xf32, #tpu.memory_space<vmem>>, %arg11: memref<8x32xf32, #tpu.memory_space<vmem>>, %arg12: memref<64x128xf32, #tpu.memory_space<vmem>>, %arg13: memref<64x32xf32, #tpu.memory_space<vmem>>) attributes {dimension_semantics = [#tpu.dimension_semantics<parallel>], iteration_bounds = array<i64: 1>, scalar_prefetch = 0 : i64, scratch_operands = 2 : i64, tpu.core_type = #tpu.core_type<tc>, window_params = [{transform_indices = @transform_0, window_bounds = array<i64: 64, 1>}, {transform_indices = @transform_1, window_bounds = array<i64: 8, 32>}, {transform_indices = @transform_2, window_bounds = array<i64: 8, 32>}, {pipeline_mode = #tpu.pipeline_mode<synchronous>, transform_indices = @transform_3, window_bounds = array<i64: 128, 128>}, {pipeline_mode = #tpu.pipeline_mode<synchronous>, transform_indices = @transform_4, window_bounds = array<i64: 32, 128>}, {pipeline_mode = #tpu.pipeline_mode<synchronous>, transform_indices = @transform_5, window_bounds = array<i64: 1, 128>}, {pipeline_mode = #tpu.pipeline_mode<synchronous>, transform_indices = @transform_6, window_bounds = array<i64: 32, 128>}, {pipeline_mode = #tpu.pipeline_mode<synchronous>, transform_indices = @transform_7, window_bounds = array<i64: 1, 128>}, {transform_indices = @transform_8, window_bounds = array<i64: 64, 128>}, {transform_indices = @transform_9, window_bounds = array<i64: 8, 32>}, {transform_indices = @transform_10, window_bounds = array<i64: 8, 32>}]} {
    %c0 = arith.constant 0 : index
    %c0_0 = arith.constant 0 : index
    %0 = vector.load %arg1[%c0, %c0_0] : memref<64x1xi32, #tpu.memory_space<vmem>>, vector<64x1xi32>
    %1 = tpu.iota {dimensions = array<i32: 1>} : vector<64x128xi32>
    %2 = vector.broadcast %0 : vector<64x1xi32> to vector<64x128xi32>
    %3 = arith.cmpi eq, %1, %2 : vector<64x128xi32>
    %4 = arith.extui %3 : vector<64x128xi1> to vector<64x128xi32>
    %5 = arith.sitofp %4 : vector<64x128xi32> to vector<64x128xf32>
    %c0_1 = arith.constant 0 : index
    %c0_2 = arith.constant 0 : index
    %6 = vector.load %arg4[%c0_1, %c0_2] : memref<128x128xf32, #tpu.memory_space<vmem>>, vector<128x128xf32>
    %cst = arith.constant dense<0.000000e+00> : vector<64x128xf32>
    %7 = tpu.matmul %5, %6, %cst {dimension_numbers = #tpu.dot_dimension_numbers<[1], [0], [0], [1], [0, 0, 1, 1], [], []>} : vector<64x128xf32>, vector<128x128xf32>, vector<64x128xf32> -> vector<64x128xf32>
    %c0_3 = arith.constant 0 : index
    %c0_4 = arith.constant 0 : index
    %8 = vector.load %arg6[%c0_3, %c0_4] : memref<1x128xf32, #tpu.memory_space<vmem>>, vector<1x128xf32>
    %9 = vector.broadcast %8 : vector<1x128xf32> to vector<64x128xf32>
    %10 = arith.addf %7, %9 : vector<64x128xf32>
    %c0_5 = arith.constant 0 : index
    %c0_6 = arith.constant 0 : index
    %11 = vector.load %arg12[%c0_5, %c0_6] : memref<64x128xf32, #tpu.memory_space<vmem>>, vector<64x128xf32>
    tpu.vector_store %arg12[%c0_5, %c0_6], %10 {strides = array<i32>} : memref<64x128xf32, #tpu.memory_space<vmem>>, vector<64x128xf32>,
    %c0_7 = arith.constant 0 : index
    %c0_8 = arith.constant 0 : index
    %12 = vector.load %arg5[%c0_7, %c0_8] : memref<32x128xf32, #tpu.memory_space<vmem>>, vector<32x128xf32>
    %c0_9 = arith.constant 0 : index
    %c0_10 = arith.constant 0 : index
    %13 = vector.load %arg2[%c0_9, %c0_10] : memref<8x32xf32, #tpu.memory_space<vmem>>, vector<8x32xf32>
    %c0_11 = arith.constant 0 : index
    %c0_12 = arith.constant 0 : index
    %14 = vector.load %arg3[%c0_11, %c0_12] : memref<8x32xf32, #tpu.memory_space<vmem>>, vector<8x32xf32>
    %c0_13 = arith.constant 0 : index
    %c0_14 = arith.constant 0 : index
    %15 = vector.load %arg12[%c0_13, %c0_14] : memref<64x128xf32, #tpu.memory_space<vmem>>, vector<8x128xf32>
    %cst_15 = arith.constant dense<0.000000e+00> : vector<8x128xf32>
    %16 = tpu.matmul %13, %12, %cst_15 {dimension_numbers = #tpu.dot_dimension_numbers<[1], [0], [0], [1], [0, 0, 1, 1], [], []>} : vector<8x32xf32>, vector<32x128xf32>, vector<8x128xf32> -> vector<8x128xf32>
    %17 = arith.addf %15, %16 : vector<8x128xf32>
    %18 = math.tanh %17 : vector<8x128xf32>
    %19 = vector.extract_strided_slice %18 {offsets = [0, 0], sizes = [8, 32], strides = [1, 1]} : vector<8x128xf32> to vector<8x32xf32>
    %cst_16 = arith.constant 5.000000e-01 : f32
    %20 = vector.broadcast %cst_16 : f32 to vector<8x32xf32>
    %21 = arith.mulf %20, %19 : vector<8x32xf32>
    %cst_17 = arith.constant 5.000000e-01 : f32
    %22 = vector.broadcast %cst_17 : f32 to vector<8x32xf32>
    %23 = arith.addf %21, %22 : vector<8x32xf32>
    %24 = vector.extract_strided_slice %18 {offsets = [0, 32], sizes = [8, 32], strides = [1, 1]} : vector<8x128xf32> to vector<8x32xf32>
    %cst_18 = arith.constant 5.000000e-01 : f32
    %25 = vector.broadcast %cst_18 : f32 to vector<8x32xf32>
    %26 = arith.mulf %25, %24 : vector<8x32xf32>
    %cst_19 = arith.constant 5.000000e-01 : f32
    %27 = vector.broadcast %cst_19 : f32 to vector<8x32xf32>
    %28 = arith.addf %26, %27 : vector<8x32xf32>
    %29 = vector.extract_strided_slice %18 {offsets = [0, 64], sizes = [8, 32], strides = [1, 1]} : vector<8x128xf32> to vector<8x32xf32>
    %30 = vector.extract_strided_slice %18 {offsets = [0, 96], sizes = [8, 32], strides = [1, 1]} : vector<8x128xf32> to vector<8x32xf32>
    %cst_20 = arith.constant 5.000000e-01 : f32
    %31 = vector.broadcast %cst_20 : f32 to vector<8x32xf32>
    %32 = arith.mulf %31, %30 : vector<8x32xf32>
    %cst_21 = arith.constant 5.000000e-01 : f32
    %33 = vector.broadcast %cst_21 : f32 to vector<8x32xf32>
    %34 = arith.addf %32, %33 : vector<8x32xf32>
    %35 = arith.mulf %28, %14 : vector<8x32xf32>
    %36 = arith.mulf %23, %29 : vector<8x32xf32>
    %37 = arith.addf %35, %36 : vector<8x32xf32>
    %38 = math.tanh %37 : vector<8x32xf32>
    %39 = arith.mulf %34, %38 : vector<8x32xf32>
    %c0_22 = arith.constant 0 : index
    %c0_23 = arith.constant 0 : index
    %40 = vector.load %arg13[%c0_22, %c0_23] : memref<64x32xf32, #tpu.memory_space<vmem>>, vector<8x32xf32>
    tpu.vector_store %arg13[%c0_22, %c0_23], %39 {strides = array<i32>} : memref<64x32xf32, #tpu.memory_space<vmem>>, vector<8x32xf32>,
    %c8 = arith.constant 8 : index
    %c0_24 = arith.constant 0 : index
    %41 = vector.load %arg12[%c8, %c0_24] : memref<64x128xf32, #tpu.memory_space<vmem>>, vector<8x128xf32>
    %cst_25 = arith.constant dense<0.000000e+00> : vector<8x128xf32>
    %42 = tpu.matmul %39, %12, %cst_25 {dimension_numbers = #tpu.dot_dimension_numbers<[1], [0], [0], [1], [0, 0, 1, 1], [], []>} : vector<8x32xf32>, vector<32x128xf32>, vector<8x128xf32> -> vector<8x128xf32>
    %43 = arith.addf %41, %42 : vector<8x128xf32>
    %44 = math.tanh %43 : vector<8x128xf32>
    %45 = vector.extract_strided_slice %44 {offsets = [0, 0], sizes = [8, 32], strides = [1, 1]} : vector<8x128xf32> to vector<8x32xf32>
    %cst_26 = arith.constant 5.000000e-01 : f32
    %46 = vector.broadcast %cst_26 : f32 to vector<8x32xf32>
    %47 = arith.mulf %46, %45 : vector<8x32xf32>
    %cst_27 = arith.constant 5.000000e-01 : f32
    %48 = vector.broadcast %cst_27 : f32 to vector<8x32xf32>
    %49 = arith.addf %47, %48 : vector<8x32xf32>
    %50 = vector.extract_strided_slice %44 {offsets = [0, 32], sizes = [8, 32], strides = [1, 1]} : vector<8x128xf32> to vector<8x32xf32>
    %cst_28 = arith.constant 5.000000e-01 : f32
    %51 = vector.broadcast %cst_28 : f32 to vector<8x32xf32>
    %52 = arith.mulf %51, %50 : vector<8x32xf32>
    %cst_29 = arith.constant 5.000000e-01 : f32
    %53 = vector.broadcast %cst_29 : f32 to vector<8x32xf32>
    %54 = arith.addf %52, %53 : vector<8x32xf32>
    %55 = vector.extract_strided_slice %44 {offsets = [0, 64], sizes = [8, 32], strides = [1, 1]} : vector<8x128xf32> to vector<8x32xf32>
    %56 = vector.extract_strided_slice %44 {offsets = [0, 96], sizes = [8, 32], strides = [1, 1]} : vector<8x128xf32> to vector<8x32xf32>
    %cst_30 = arith.constant 5.000000e-01 : f32
    %57 = vector.broadcast %cst_30 : f32 to vector<8x32xf32>
    %58 = arith.mulf %57, %56 : vector<8x32xf32>
    %cst_31 = arith.constant 5.000000e-01 : f32
    %59 = vector.broadcast %cst_31 : f32 to vector<8x32xf32>
    %60 = arith.addf %58, %59 : vector<8x32xf32>
    %61 = arith.mulf %54, %37 : vector<8x32xf32>
    %62 = arith.mulf %49, %55 : vector<8x32xf32>
    %63 = arith.addf %61, %62 : vector<8x32xf32>
    %64 = math.tanh %63 : vector<8x32xf32>
    %65 = arith.mulf %60, %64 : vector<8x32xf32>
    %c8_32 = arith.constant 8 : index
    %c0_33 = arith.constant 0 : index
    %66 = vector.load %arg13[%c8_32, %c0_33] : memref<64x32xf32, #tpu.memory_space<vmem>>, vector<8x32xf32>
    tpu.vector_store %arg13[%c8_32, %c0_33], %65 {strides = array<i32>} : memref<64x32xf32, #tpu.memory_space<vmem>>, vector<8x32xf32>,
    %c16 = arith.constant 16 : index
    %c0_34 = arith.constant 0 : index
    %67 = vector.load %arg12[%c16, %c0_34] : memref<64x128xf32, #tpu.memory_space<vmem>>, vector<8x128xf32>
    %cst_35 = arith.constant dense<0.000000e+00> : vector<8x128xf32>
    %68 = tpu.matmul %65, %12, %cst_35 {dimension_numbers = #tpu.dot_dimension_numbers<[1], [0], [0], [1], [0, 0, 1, 1], [], []>} : vector<8x32xf32>, vector<32x128xf32>, vector<8x128xf32> -> vector<8x128xf32>
    %69 = arith.addf %67, %68 : vector<8x128xf32>
    %70 = math.tanh %69 : vector<8x128xf32>
    %71 = vector.extract_strided_slice %70 {offsets = [0, 0], sizes = [8, 32], strides = [1, 1]} : vector<8x128xf32> to vector<8x32xf32>
    %cst_36 = arith.constant 5.000000e-01 : f32
    %72 = vector.broadcast %cst_36 : f32 to vector<8x32xf32>
    %73 = arith.mulf %72, %71 : vector<8x32xf32>
    %cst_37 = arith.constant 5.000000e-01 : f32
    %74 = vector.broadcast %cst_37 : f32 to vector<8x32xf32>
    %75 = arith.addf %73, %74 : vector<8x32xf32>
    %76 = vector.extract_strided_slice %70 {offsets = [0, 32], sizes = [8, 32], strides = [1, 1]} : vector<8x128xf32> to vector<8x32xf32>
    %cst_38 = arith.constant 5.000000e-01 : f32
    %77 = vector.broadcast %cst_38 : f32 to vector<8x32xf32>
    %78 = arith.mulf %77, %76 : vector<8x32xf32>
    %cst_39 = arith.constant 5.000000e-01 : f32
    %79 = vector.broadcast %cst_39 : f32 to vector<8x32xf32>
    %80 = arith.addf %78, %79 : vector<8x32xf32>
    %81 = vector.extract_strided_slice %70 {offsets = [0, 64], sizes = [8, 32], strides = [1, 1]} : vector<8x128xf32> to vector<8x32xf32>
    %82 = vector.extract_strided_slice %70 {offsets = [0, 96], sizes = [8, 32], strides = [1, 1]} : vector<8x128xf32> to vector<8x32xf32>
    %cst_40 = arith.constant 5.000000e-01 : f32
    %83 = vector.broadcast %cst_40 : f32 to vector<8x32xf32>
    %84 = arith.mulf %83, %82 : vector<8x32xf32>
    %cst_41 = arith.constant 5.000000e-01 : f32
    %85 = vector.broadcast %cst_41 : f32 to vector<8x32xf32>
    %86 = arith.addf %84, %85 : vector<8x32xf32>
    %87 = arith.mulf %80, %63 : vector<8x32xf32>
    %88 = arith.mulf %75, %81 : vector<8x32xf32>
    %89 = arith.addf %87, %88 : vector<8x32xf32>
    %90 = math.tanh %89 : vector<8x32xf32>
    %91 = arith.mulf %86, %90 : vector<8x32xf32>
    %c16_42 = arith.constant 16 : index
    %c0_43 = arith.constant 0 : index
    %92 = vector.load %arg13[%c16_42, %c0_43] : memref<64x32xf32, #tpu.memory_space<vmem>>, vector<8x32xf32>
    tpu.vector_store %arg13[%c16_42, %c0_43], %91 {strides = array<i32>} : memref<64x32xf32, #tpu.memory_space<vmem>>, vector<8x32xf32>,
    %c24 = arith.constant 24 : index
    %c0_44 = arith.constant 0 : index
    %93 = vector.load %arg12[%c24, %c0_44] : memref<64x128xf32, #tpu.memory_space<vmem>>, vector<8x128xf32>
    %cst_45 = arith.constant dense<0.000000e+00> : vector<8x128xf32>
    %94 = tpu.matmul %91, %12, %cst_45 {dimension_numbers = #tpu.dot_dimension_numbers<[1], [0], [0], [1], [0, 0, 1, 1], [], []>} : vector<8x32xf32>, vector<32x128xf32>, vector<8x128xf32> -> vector<8x128xf32>
    %95 = arith.addf %93, %94 : vector<8x128xf32>
    %96 = math.tanh %95 : vector<8x128xf32>
    %97 = vector.extract_strided_slice %96 {offsets = [0, 0], sizes = [8, 32], strides = [1, 1]} : vector<8x128xf32> to vector<8x32xf32>
    %cst_46 = arith.constant 5.000000e-01 : f32
    %98 = vector.broadcast %cst_46 : f32 to vector<8x32xf32>
    %99 = arith.mulf %98, %97 : vector<8x32xf32>
    %cst_47 = arith.constant 5.000000e-01 : f32
    %100 = vector.broadcast %cst_47 : f32 to vector<8x32xf32>
    %101 = arith.addf %99, %100 : vector<8x32xf32>
    %102 = vector.extract_strided_slice %96 {offsets = [0, 32], sizes = [8, 32], strides = [1, 1]} : vector<8x128xf32> to vector<8x32xf32>
    %cst_48 = arith.constant 5.000000e-01 : f32
    %103 = vector.broadcast %cst_48 : f32 to vector<8x32xf32>
    %104 = arith.mulf %103, %102 : vector<8x32xf32>
    %cst_49 = arith.constant 5.000000e-01 : f32
    %105 = vector.broadcast %cst_49 : f32 to vector<8x32xf32>
    %106 = arith.addf %104, %105 : vector<8x32xf32>
    %107 = vector.extract_strided_slice %96 {offsets = [0, 64], sizes = [8, 32], strides = [1, 1]} : vector<8x128xf32> to vector<8x32xf32>
    %108 = vector.extract_strided_slice %96 {offsets = [0, 96], sizes = [8, 32], strides = [1, 1]} : vector<8x128xf32> to vector<8x32xf32>
    %cst_50 = arith.constant 5.000000e-01 : f32
    %109 = vector.broadcast %cst_50 : f32 to vector<8x32xf32>
    %110 = arith.mulf %109, %108 : vector<8x32xf32>
    %cst_51 = arith.constant 5.000000e-01 : f32
    %111 = vector.broadcast %cst_51 : f32 to vector<8x32xf32>
    %112 = arith.addf %110, %111 : vector<8x32xf32>
    %113 = arith.mulf %106, %89 : vector<8x32xf32>
    %114 = arith.mulf %101, %107 : vector<8x32xf32>
    %115 = arith.addf %113, %114 : vector<8x32xf32>
    %116 = math.tanh %115 : vector<8x32xf32>
    %117 = arith.mulf %112, %116 : vector<8x32xf32>
    %c24_52 = arith.constant 24 : index
    %c0_53 = arith.constant 0 : index
    %118 = vector.load %arg13[%c24_52, %c0_53] : memref<64x32xf32, #tpu.memory_space<vmem>>, vector<8x32xf32>
    tpu.vector_store %arg13[%c24_52, %c0_53], %117 {strides = array<i32>} : memref<64x32xf32, #tpu.memory_space<vmem>>, vector<8x32xf32>,
    %c32 = arith.constant 32 : index
    %c0_54 = arith.constant 0 : index
    %119 = vector.load %arg12[%c32, %c0_54] : memref<64x128xf32, #tpu.memory_space<vmem>>, vector<8x128xf32>
    %cst_55 = arith.constant dense<0.000000e+00> : vector<8x128xf32>
    %120 = tpu.matmul %117, %12, %cst_55 {dimension_numbers = #tpu.dot_dimension_numbers<[1], [0], [0], [1], [0, 0, 1, 1], [], []>} : vector<8x32xf32>, vector<32x128xf32>, vector<8x128xf32> -> vector<8x128xf32>
    %121 = arith.addf %119, %120 : vector<8x128xf32>
    %122 = math.tanh %121 : vector<8x128xf32>
    %123 = vector.extract_strided_slice %122 {offsets = [0, 0], sizes = [8, 32], strides = [1, 1]} : vector<8x128xf32> to vector<8x32xf32>
    %cst_56 = arith.constant 5.000000e-01 : f32
    %124 = vector.broadcast %cst_56 : f32 to vector<8x32xf32>
    %125 = arith.mulf %124, %123 : vector<8x32xf32>
    %cst_57 = arith.constant 5.000000e-01 : f32
    %126 = vector.broadcast %cst_57 : f32 to vector<8x32xf32>
    %127 = arith.addf %125, %126 : vector<8x32xf32>
    %128 = vector.extract_strided_slice %122 {offsets = [0, 32], sizes = [8, 32], strides = [1, 1]} : vector<8x128xf32> to vector<8x32xf32>
    %cst_58 = arith.constant 5.000000e-01 : f32
    %129 = vector.broadcast %cst_58 : f32 to vector<8x32xf32>
    %130 = arith.mulf %129, %128 : vector<8x32xf32>
    %cst_59 = arith.constant 5.000000e-01 : f32
    %131 = vector.broadcast %cst_59 : f32 to vector<8x32xf32>
    %132 = arith.addf %130, %131 : vector<8x32xf32>
    %133 = vector.extract_strided_slice %122 {offsets = [0, 64], sizes = [8, 32], strides = [1, 1]} : vector<8x128xf32> to vector<8x32xf32>
    %134 = vector.extract_strided_slice %122 {offsets = [0, 96], sizes = [8, 32], strides = [1, 1]} : vector<8x128xf32> to vector<8x32xf32>
    %cst_60 = arith.constant 5.000000e-01 : f32
    %135 = vector.broadcast %cst_60 : f32 to vector<8x32xf32>
    %136 = arith.mulf %135, %134 : vector<8x32xf32>
    %cst_61 = arith.constant 5.000000e-01 : f32
    %137 = vector.broadcast %cst_61 : f32 to vector<8x32xf32>
    %138 = arith.addf %136, %137 : vector<8x32xf32>
    %139 = arith.mulf %132, %115 : vector<8x32xf32>
    %140 = arith.mulf %127, %133 : vector<8x32xf32>
    %141 = arith.addf %139, %140 : vector<8x32xf32>
    %142 = math.tanh %141 : vector<8x32xf32>
    %143 = arith.mulf %138, %142 : vector<8x32xf32>
    %c32_62 = arith.constant 32 : index
    %c0_63 = arith.constant 0 : index
    %144 = vector.load %arg13[%c32_62, %c0_63] : memref<64x32xf32, #tpu.memory_space<vmem>>, vector<8x32xf32>
    tpu.vector_store %arg13[%c32_62, %c0_63], %143 {strides = array<i32>} : memref<64x32xf32, #tpu.memory_space<vmem>>, vector<8x32xf32>,
    %c40 = arith.constant 40 : index
    %c0_64 = arith.constant 0 : index
    %145 = vector.load %arg12[%c40, %c0_64] : memref<64x128xf32, #tpu.memory_space<vmem>>, vector<8x128xf32>
    %cst_65 = arith.constant dense<0.000000e+00> : vector<8x128xf32>
    %146 = tpu.matmul %143, %12, %cst_65 {dimension_numbers = #tpu.dot_dimension_numbers<[1], [0], [0], [1], [0, 0, 1, 1], [], []>} : vector<8x32xf32>, vector<32x128xf32>, vector<8x128xf32> -> vector<8x128xf32>
    %147 = arith.addf %145, %146 : vector<8x128xf32>
    %148 = math.tanh %147 : vector<8x128xf32>
    %149 = vector.extract_strided_slice %148 {offsets = [0, 0], sizes = [8, 32], strides = [1, 1]} : vector<8x128xf32> to vector<8x32xf32>
    %cst_66 = arith.constant 5.000000e-01 : f32
    %150 = vector.broadcast %cst_66 : f32 to vector<8x32xf32>
    %151 = arith.mulf %150, %149 : vector<8x32xf32>
    %cst_67 = arith.constant 5.000000e-01 : f32
    %152 = vector.broadcast %cst_67 : f32 to vector<8x32xf32>
    %153 = arith.addf %151, %152 : vector<8x32xf32>
    %154 = vector.extract_strided_slice %148 {offsets = [0, 32], sizes = [8, 32], strides = [1, 1]} : vector<8x128xf32> to vector<8x32xf32>
    %cst_68 = arith.constant 5.000000e-01 : f32
    %155 = vector.broadcast %cst_68 : f32 to vector<8x32xf32>
    %156 = arith.mulf %155, %154 : vector<8x32xf32>
    %cst_69 = arith.constant 5.000000e-01 : f32
    %157 = vector.broadcast %cst_69 : f32 to vector<8x32xf32>
    %158 = arith.addf %156, %157 : vector<8x32xf32>
    %159 = vector.extract_strided_slice %148 {offsets = [0, 64], sizes = [8, 32], strides = [1, 1]} : vector<8x128xf32> to vector<8x32xf32>
    %160 = vector.extract_strided_slice %148 {offsets = [0, 96], sizes = [8, 32], strides = [1, 1]} : vector<8x128xf32> to vector<8x32xf32>
    %cst_70 = arith.constant 5.000000e-01 : f32
    %161 = vector.broadcast %cst_70 : f32 to vector<8x32xf32>
    %162 = arith.mulf %161, %160 : vector<8x32xf32>
    %cst_71 = arith.constant 5.000000e-01 : f32
    %163 = vector.broadcast %cst_71 : f32 to vector<8x32xf32>
    %164 = arith.addf %162, %163 : vector<8x32xf32>
    %165 = arith.mulf %158, %141 : vector<8x32xf32>
    %166 = arith.mulf %153, %159 : vector<8x32xf32>
    %167 = arith.addf %165, %166 : vector<8x32xf32>
    %168 = math.tanh %167 : vector<8x32xf32>
    %169 = arith.mulf %164, %168 : vector<8x32xf32>
    %c40_72 = arith.constant 40 : index
    %c0_73 = arith.constant 0 : index
    %170 = vector.load %arg13[%c40_72, %c0_73] : memref<64x32xf32, #tpu.memory_space<vmem>>, vector<8x32xf32>
    tpu.vector_store %arg13[%c40_72, %c0_73], %169 {strides = array<i32>} : memref<64x32xf32, #tpu.memory_space<vmem>>, vector<8x32xf32>,
    %c48 = arith.constant 48 : index
    %c0_74 = arith.constant 0 : index
    %171 = vector.load %arg12[%c48, %c0_74] : memref<64x128xf32, #tpu.memory_space<vmem>>, vector<8x128xf32>
    %cst_75 = arith.constant dense<0.000000e+00> : vector<8x128xf32>
    %172 = tpu.matmul %169, %12, %cst_75 {dimension_numbers = #tpu.dot_dimension_numbers<[1], [0], [0], [1], [0, 0, 1, 1], [], []>} : vector<8x32xf32>, vector<32x128xf32>, vector<8x128xf32> -> vector<8x128xf32>
    %173 = arith.addf %171, %172 : vector<8x128xf32>
    %174 = math.tanh %173 : vector<8x128xf32>
    %175 = vector.extract_strided_slice %174 {offsets = [0, 0], sizes = [8, 32], strides = [1, 1]} : vector<8x128xf32> to vector<8x32xf32>
    %cst_76 = arith.constant 5.000000e-01 : f32
    %176 = vector.broadcast %cst_76 : f32 to vector<8x32xf32>
    %177 = arith.mulf %176, %175 : vector<8x32xf32>
    %cst_77 = arith.constant 5.000000e-01 : f32
    %178 = vector.broadcast %cst_77 : f32 to vector<8x32xf32>
    %179 = arith.addf %177, %178 : vector<8x32xf32>
    %180 = vector.extract_strided_slice %174 {offsets = [0, 32], sizes = [8, 32], strides = [1, 1]} : vector<8x128xf32> to vector<8x32xf32>
    %cst_78 = arith.constant 5.000000e-01 : f32
    %181 = vector.broadcast %cst_78 : f32 to vector<8x32xf32>
    %182 = arith.mulf %181, %180 : vector<8x32xf32>
    %cst_79 = arith.constant 5.000000e-01 : f32
    %183 = vector.broadcast %cst_79 : f32 to vector<8x32xf32>
    %184 = arith.addf %182, %183 : vector<8x32xf32>
    %185 = vector.extract_strided_slice %174 {offsets = [0, 64], sizes = [8, 32], strides = [1, 1]} : vector<8x128xf32> to vector<8x32xf32>
    %186 = vector.extract_strided_slice %174 {offsets = [0, 96], sizes = [8, 32], strides = [1, 1]} : vector<8x128xf32> to vector<8x32xf32>
    %cst_80 = arith.constant 5.000000e-01 : f32
    %187 = vector.broadcast %cst_80 : f32 to vector<8x32xf32>
    %188 = arith.mulf %187, %186 : vector<8x32xf32>
    %cst_81 = arith.constant 5.000000e-01 : f32
    %189 = vector.broadcast %cst_81 : f32 to vector<8x32xf32>
    %190 = arith.addf %188, %189 : vector<8x32xf32>
    %191 = arith.mulf %184, %167 : vector<8x32xf32>
    %192 = arith.mulf %179, %185 : vector<8x32xf32>
    %193 = arith.addf %191, %192 : vector<8x32xf32>
    %194 = math.tanh %193 : vector<8x32xf32>
    %195 = arith.mulf %190, %194 : vector<8x32xf32>
    %c48_82 = arith.constant 48 : index
    %c0_83 = arith.constant 0 : index
    %196 = vector.load %arg13[%c48_82, %c0_83] : memref<64x32xf32, #tpu.memory_space<vmem>>, vector<8x32xf32>
    tpu.vector_store %arg13[%c48_82, %c0_83], %195 {strides = array<i32>} : memref<64x32xf32, #tpu.memory_space<vmem>>, vector<8x32xf32>,
    %c56 = arith.constant 56 : index
    %c0_84 = arith.constant 0 : index
    %197 = vector.load %arg12[%c56, %c0_84] : memref<64x128xf32, #tpu.memory_space<vmem>>, vector<8x128xf32>
    %cst_85 = arith.constant dense<0.000000e+00> : vector<8x128xf32>
    %198 = tpu.matmul %195, %12, %cst_85 {dimension_numbers = #tpu.dot_dimension_numbers<[1], [0], [0], [1], [0, 0, 1, 1], [], []>} : vector<8x32xf32>, vector<32x128xf32>, vector<8x128xf32> -> vector<8x128xf32>
    %199 = arith.addf %197, %198 : vector<8x128xf32>
    %200 = math.tanh %199 : vector<8x128xf32>
    %201 = vector.extract_strided_slice %200 {offsets = [0, 0], sizes = [8, 32], strides = [1, 1]} : vector<8x128xf32> to vector<8x32xf32>
    %cst_86 = arith.constant 5.000000e-01 : f32
    %202 = vector.broadcast %cst_86 : f32 to vector<8x32xf32>
    %203 = arith.mulf %202, %201 : vector<8x32xf32>
    %cst_87 = arith.constant 5.000000e-01 : f32
    %204 = vector.broadcast %cst_87 : f32 to vector<8x32xf32>
    %205 = arith.addf %203, %204 : vector<8x32xf32>
    %206 = vector.extract_strided_slice %200 {offsets = [0, 32], sizes = [8, 32], strides = [1, 1]} : vector<8x128xf32> to vector<8x32xf32>
    %cst_88 = arith.constant 5.000000e-01 : f32
    %207 = vector.broadcast %cst_88 : f32 to vector<8x32xf32>
    %208 = arith.mulf %207, %206 : vector<8x32xf32>
    %cst_89 = arith.constant 5.000000e-01 : f32
    %209 = vector.broadcast %cst_89 : f32 to vector<8x32xf32>
    %210 = arith.addf %208, %209 : vector<8x32xf32>
    %211 = vector.extract_strided_slice %200 {offsets = [0, 64], sizes = [8, 32], strides = [1, 1]} : vector<8x128xf32> to vector<8x32xf32>
    %212 = vector.extract_strided_slice %200 {offsets = [0, 96], sizes = [8, 32], strides = [1, 1]} : vector<8x128xf32> to vector<8x32xf32>
    %cst_90 = arith.constant 5.000000e-01 : f32
    %213 = vector.broadcast %cst_90 : f32 to vector<8x32xf32>
    %214 = arith.mulf %213, %212 : vector<8x32xf32>
    %cst_91 = arith.constant 5.000000e-01 : f32
    %215 = vector.broadcast %cst_91 : f32 to vector<8x32xf32>
    %216 = arith.addf %214, %215 : vector<8x32xf32>
    %217 = arith.mulf %210, %193 : vector<8x32xf32>
    %218 = arith.mulf %205, %211 : vector<8x32xf32>
    %219 = arith.addf %217, %218 : vector<8x32xf32>
    %220 = math.tanh %219 : vector<8x32xf32>
    %221 = arith.mulf %216, %220 : vector<8x32xf32>
    %c56_92 = arith.constant 56 : index
    %c0_93 = arith.constant 0 : index
    %222 = vector.load %arg13[%c56_92, %c0_93] : memref<64x32xf32, #tpu.memory_space<vmem>>, vector<8x32xf32>
    tpu.vector_store %arg13[%c56_92, %c0_93], %221 {strides = array<i32>} : memref<64x32xf32, #tpu.memory_space<vmem>>, vector<8x32xf32>,
    %c0_94 = arith.constant 0 : index
    %c0_95 = arith.constant 0 : index
    %223 = vector.load %arg10[%c0_94, %c0_95] : memref<8x32xf32, #tpu.memory_space<vmem>>, vector<8x32xf32>
    tpu.vector_store %arg10[%c0_94, %c0_95], %221 {strides = array<i32>} : memref<8x32xf32, #tpu.memory_space<vmem>>, vector<8x32xf32>,
    %c0_96 = arith.constant 0 : index
    %c0_97 = arith.constant 0 : index
    %224 = vector.load %arg11[%c0_96, %c0_97] : memref<8x32xf32, #tpu.memory_space<vmem>>, vector<8x32xf32>
    tpu.vector_store %arg11[%c0_96, %c0_97], %219 {strides = array<i32>} : memref<8x32xf32, #tpu.memory_space<vmem>>, vector<8x32xf32>,
    %c0_98 = arith.constant 0 : index
    %c0_99 = arith.constant 0 : index
    %225 = vector.load %arg13[%c0_98, %c0_99] : memref<64x32xf32, #tpu.memory_space<vmem>>, vector<64x32xf32>
    %c0_100 = arith.constant 0 : index
    %c0_101 = arith.constant 0 : index
    %226 = vector.load %arg7[%c0_100, %c0_101] : memref<32x128xf32, #tpu.memory_space<vmem>>, vector<32x128xf32>
    %cst_102 = arith.constant dense<0.000000e+00> : vector<64x128xf32>
    %227 = tpu.matmul %225, %226, %cst_102 {dimension_numbers = #tpu.dot_dimension_numbers<[1], [0], [0], [1], [0, 0, 1, 1], [], []>} : vector<64x32xf32>, vector<32x128xf32>, vector<64x128xf32> -> vector<64x128xf32>
    %c0_103 = arith.constant 0 : index
    %c0_104 = arith.constant 0 : index
    %228 = vector.load %arg8[%c0_103, %c0_104] : memref<1x128xf32, #tpu.memory_space<vmem>>, vector<1x128xf32>
    %229 = vector.broadcast %228 : vector<1x128xf32> to vector<64x128xf32>
    %230 = arith.addf %227, %229 : vector<64x128xf32>
    %c0_105 = arith.constant 0 : index
    %c0_106 = arith.constant 0 : index
    %231 = vector.load %arg9[%c0_105, %c0_106] : memref<64x128xf32, #tpu.memory_space<vmem>>, vector<64x128xf32>
    tpu.vector_store %arg9[%c0_105, %c0_106], %230 {strides = array<i32>} : memref<64x128xf32, #tpu.memory_space<vmem>>, vector<64x128xf32>,
    return
  }
  func.func @transform_0(%arg0: i32) -> (i32, i32) {
    %c0_i32 = arith.constant 0 : i32
    %c0_i32_0 = arith.constant 0 : i32
    return %arg0, %c0_i32 : i32, i32
  }
  func.func @transform_1(%arg0: i32) -> (i32, i32) {
    %c0_i32 = arith.constant 0 : i32
    %c0_i32_0 = arith.constant 0 : i32
    return %arg0, %c0_i32 : i32, i32
  }
  func.func @transform_2(%arg0: i32) -> (i32, i32) {
    %c0_i32 = arith.constant 0 : i32
    %c0_i32_0 = arith.constant 0 : i32
    return %arg0, %c0_i32 : i32, i32
  }
  func.func @transform_3(%arg0: i32) -> (i32, i32) {
    %c0_i32 = arith.constant 0 : i32
    %c0_i32_0 = arith.constant 0 : i32
    %c0_i32_1 = arith.constant 0 : i32
    return %c0_i32, %c0_i32_0 : i32, i32
  }
  func.func @transform_4(%arg0: i32) -> (i32, i32) {
    %c0_i32 = arith.constant 0 : i32
    %c0_i32_0 = arith.constant 0 : i32
    %c0_i32_1 = arith.constant 0 : i32
    return %c0_i32, %c0_i32_0 : i32, i32
  }
  func.func @transform_5(%arg0: i32) -> (i32, i32) {
    %c0_i32 = arith.constant 0 : i32
    %c0_i32_0 = arith.constant 0 : i32
    %c0_i32_1 = arith.constant 0 : i32
    return %c0_i32, %c0_i32_0 : i32, i32
  }
  func.func @transform_6(%arg0: i32) -> (i32, i32) {
    %c0_i32 = arith.constant 0 : i32
    %c0_i32_0 = arith.constant 0 : i32
    %c0_i32_1 = arith.constant 0 : i32
    return %c0_i32, %c0_i32_0 : i32, i32
  }
  func.func @transform_7(%arg0: i32) -> (i32, i32) {
    %c0_i32 = arith.constant 0 : i32
    %c0_i32_0 = arith.constant 0 : i32
    %c0_i32_1 = arith.constant 0 : i32
    return %c0_i32, %c0_i32_0 : i32, i32
  }
  func.func @transform_8(%arg0: i32) -> (i32, i32) {
    %c0_i32 = arith.constant 0 : i32
    %c0_i32_0 = arith.constant 0 : i32
    return %arg0, %c0_i32 : i32, i32
  }
  func.func @transform_9(%arg0: i32) -> (i32, i32) {
    %c0_i32 = arith.constant 0 : i32
    %c0_i32_0 = arith.constant 0 : i32
    return %arg0, %c0_i32 : i32, i32
  }
  func.func @transform_10(%arg0: i32) -> (i32, i32) {
    %c0_i32 = arith.constant 0 : i32
    %c0_i32_0 = arith.constant 0 : i32
    return %arg0, %c0_i32 : i32, i32
  }
}

</mosaic_0001>

<bundles_post_ra>
// kernel: tpu_custom_call.1
= control target key start
LH: loop header
LB: loop body
LE: loop exit
PB: predicated region body
PF: predicated region fallthrough
CT: control target
= control target key end

     0   :  { %16 = vsyncpa [#allocation5], 0  ;;  %s2121_s0 = inlined_call_operand.vmem [shape: s32[64,1], index: 0, kind: input, shape index: {}]   ;;  %s2122_s1 = inlined_call_operand.hbm [shape: f32[8,32], index: 1, kind: input, shape index: {}]   ;;  %s2123_s2 = inlined_call_operand.vmem [shape: f32[8,32], index: 2, kind: input, shape index: {}]   ;;  %s2124_s3 = inlined_call_operand.hbm [shape: f32[128,128], index: 3, kind: input, shape index: {}]   ;;  %s2125_s4 = inlined_call_operand.vmem [shape: f32[32,128], index: 4, kind: input, shape index: {}]   ;;  %s2126_s5 = inlined_call_operand.vmem [shape: f32[1,128], index: 5, kind: input, shape index: {}]   ;;  %s2127_s6 = inlined_call_operand.vmem [shape: f32[32,128], index: 6, kind: input, shape index: {}]   ;;  %s2128_s7 = inlined_call_operand.vmem [shape: f32[1,128], index: 7, kind: input, shape index: {}]   ;;  %s2129_s8 = inlined_call_operand.hbm [shape: f32[64,128], index: 8, kind: output, shape index: {0}]   ;;  %s2130_s9 = inlined_call_operand.hbm [shape: f32[8,32], index: 9, kind: output, shape index: {1}]   ;;  %s2131_s10 = inlined_call_operand.hbm [shape: f32[8,32], index: 10, kind: output, shape index: {2}]  }
   0x1   :  { %17 = vsyncpa [#allocation8], 0 }
   0x2   :  { %18 = vsyncpa [#allocation6], 0 }
   0x3   :  { %19 = vsyncpa [#allocation11], 0  ;;  %s1782_s13 = smov [#allocation4]   ;;  %s1783_s15 = smov [#allocation7]  }
   0x4   :  { %s28_s14 = sshll.u32 %s1782_s13, 4  ;;  %s39_s16 = sshll.u32 %s1783_s15, 4  ;;  %s29_s14 = int_to_ptr.vmem [resolvable:$true] %s28_s14  ;;  %s1852_s16 = int_to_ptr.vmem [resolvable:$true] %s39_s16 }
   0x5   :  { %s1664_s19 = scalar_lea.hbm %s2122_s1, 128 }
   0x6   :  { %p1665_p0 = scmp.ne.s32.totalorder %s2122_s1, %s1664_s19  ;;  %p1668_p1 = scmp.lt.u32.totalorder %s1664_s19, %s2122_s1 }
   0x8   :  { %p1670_p2 = pnand %p1668_p1, %p1665_p0 }
   0xa   :  { %1673 = shalt.err (!%p1670_p2)
}
   0xb   :  { %s1674_s24 = scalar_lea.vmem %s29_s14, 128  ;;  %p1679_p4 = scmp.lt.s32.totalorder %s29_s14, %s29_s14 }
   0xc   :  { %p1675_p3 = scmp.ne.s32.totalorder %s29_s14, %s1674_s24  ;;  %p1680_p5 = scmp.lt.s32.totalorder %s1674_s24, %s1674_s24 }
   0xe   :  { %p1681_p6 = por %p1680_p5, %p1679_p4 }
  0x10   :  { %p1682_p7 = pnand %p1681_p6, %p1675_p3 }
  0x12   :  { %1685 = shalt.err (!%p1682_p7)
}
  0x13   :  { %31 = dma.hbm_to_vmem [thread:$0]  %s2122_s1, 128, %s29_s14, [#allocation5]  }
  0x14   :  { %s1686_s29 = scalar_lea.hbm %s2124_s3, 2048 }
  0x15   :  { %p1687_p8 = scmp.ne.s32.totalorder %s2124_s3, %s1686_s29  ;;  %p1690_p9 = scmp.lt.u32.totalorder %s1686_s29, %s2124_s3 }
  0x17   :  { %p1692_p10 = pnand %p1690_p9, %p1687_p8 }
  0x19   :  { %1695 = shalt.err (!%p1692_p10)
}
  0x1a   :  { %s1696_s15 = scalar_lea.vmem %s1852_s16, 2048  ;;  %p1701_p12 = scmp.lt.s32.totalorder %s1852_s16, %s1852_s16 }
  0x1b   :  { %p1697_p11 = scmp.ne.s32.totalorder %s1852_s16, %s1696_s15  ;;  %p1702_p13 = scmp.lt.s32.totalorder %s1696_s15, %s1696_s15 }
  0x1d   :  { %p1703_p0 = por %p1702_p13, %p1701_p12 }
  0x1f   :  { %p1704_p1 = pnand %p1703_p0, %p1697_p11 }
  0x21   :  { %1707 = shalt.err (!%p1704_p1)
}
  0x22   :  { %s1784_s1 = smov 128   ;;  %s1785_s14 = smov 8  }
  0x23   :  { %45 = dma.hbm_to_vmem [thread:$0]  %s2124_s3, 2048, %s1852_s16, [#allocation8], %s1784_s1, %s1784_s1, %s1785_s14  }
  0x24   :  { %1774 = dma.done.wait [#allocation5], 128  }
  0x25   :  { %1775 = vsyncadd [#allocation5], 4294967168 }
  0x26   :  { %1776 = dma.done.wait [#allocation8], 2048  }
  0x27   :  { %1777 = vsyncadd [#allocation8], 4294965248  ;;  %v1786_v0 = vmov 0   ;;  %v62_v1 = vld [vmem:[%s2121_s0 + $0x10] sm:$0xff]  ;;  %v60_v2 = vld [vmem:[%s2121_s0] sm:$0xff]  ;;  %v1787_v15 = vmov 0.0|0.0   ;;  %v68_v42 = vlaneseq }
  0x28   :  { %1631 = vset.pattern.permute.xlu1 %v1786_v0  ;;  %1630 = vset.pattern.permute.xlu0 %v1786_v0  ;;  %v63_v3 = vld [vmem:[%s2121_s0 + $0x18] sm:$0xff]  ;;  %v61_v4 = vld [vmem:[%s2121_s0 + $0x8] sm:$0xff]  ;;  %v118_v5 = vld [vmem:[#allocation7] sm:$0xff]  ;;  %vm1788_vm0 = vmmov 0   ;;  %v1789_v33 = vmov 0.0   ;;  %s1790_s23 = smov 32  }
  0x29   :  { %77 = vperm.xlu1 %1631, %v62_v1   ;;  %71 = vperm.xlu0 %1630, %v60_v2   ;;  %v119_v6 = vld [vmem:[#allocation7 + $0x8] sm:$0xff]  ;;  %v120_v7 = vld [vmem:[#allocation7 + $0x10] sm:$0xff]  ;;  %v121_v8 = vld [vmem:[#allocation7 + $0x18] sm:$0xff]  ;;  %v69_v43 = vand.u32 127, %v68_v42  ;;  %v1791_v46 = vmov 1.0   ;;  %vm261_vm9 = vcmask 261120  }
  0x2a   :  { %v1527_v9 = vpack.c.bf16 %v119_v6, %v118_v5  ;;  %v1531_v10 = vpack.c.bf16 %v121_v8, %v120_v7  ;;  %v122_v11 = vld [vmem:[#allocation7 + $0x20] sm:$0xff]  ;;  %v123_v12 = vld [vmem:[#allocation7 + $0x28] sm:$0xff]  ;;  %v65_v13 = vld [vmem:[%s2121_s0 + $0x28] sm:$0xff]  ;;  %1565 = vmatprep.subr.bf16.mxu1 %v1787_v15  ;;  %1438 = vmatprep.mubr.msk.f32.mxu1 %vm1788_vm0, %v1789_v33  ;;  %s1794_s12 = smov [#allocation10]  }
  0x2b   :  { %v64_v14 = vld [vmem:[%s2121_s0 + $0x20] sm:$0xff]  ;;  %v1535_v16 = vpack.c.bf16 %v123_v12, %v122_v11  ;;  %v255_v18 = vld [vmem:[%s2125_s4 + $0x8] sm:$0xff]  ;;  %v67_v22 = vld [vmem:[%s2121_s0 + $0x38] sm:$0xff]  ;;  %s1238_s13 = sshll.u32 %s1794_s12, 4  ;;  %s1239_s13 = int_to_ptr.vmem [resolvable:$true] %s1238_s13 }
  0x2c   :  { %1528 = vmatprep.subr.bf16.mxu0 %v1527_v9  ;;  %v254_v17 = vld [vmem:[%s2125_s4] sm:$0xff]  ;;  %v125_v20 = vld [vmem:[#allocation7 + $0x38] sm:$0xff]  ;;  %v66_v23 = vld [vmem:[%s2121_s0 + $0x30] sm:$0xff]  ;;  %s1708_s15 = scalar_lea.vmem %s1239_s13, 128  ;;  %p1713_p3 = scmp.lt.s32.totalorder %s1239_s13, %s1239_s13 }
  0x2d   :  { %80 = vperm.xlu1 %1631, %v63_v3   ;;  %74 = vperm.xlu0 %1630, %v61_v4   ;;  %v124_v19 = vld [vmem:[#allocation7 + $0x30] sm:$0xff]  ;;  %v1911_v21 = vpack.c.bf16 %v255_v18, %v254_v17  ;;  %v126_v25 = vld [vmem:[#allocation7 + $0x40] sm:$0xff]  ;;  %v127_v26 = vld [vmem:[#allocation7 + $0x48] sm:$0xff]  ;;  %p1709_p2 = scmp.ne.s32.totalorder %s1239_s13, %s1708_s15  ;;  %p1714_p4 = scmp.lt.s32.totalorder %s1708_s15, %s1708_s15 }
  0x2e   :  { %1530 = vmatpush3.bf16.msra.mxu0 %v1527_v9  ;;  %v1539_v24 = vpack.c.bf16 %v125_v20, %v124_v19  ;;  %v256_v27 = vld [vmem:[%s2125_s4 + $0x10] sm:$0xff]  ;;  %v257_v28 = vld [vmem:[%s2125_s4 + $0x18] sm:$0xff]  ;;  %v1543_v30 = vpack.c.bf16 %v127_v26, %v126_v25  ;;  %v128_v31 = vld [vmem:[#allocation7 + $0x50] sm:$0xff] }
  0x2f   :  { %1532 = vmatprep.subr.bf16.mxu0 %v1531_v10  ;;  %1567 = vmatpush3.bf16.msra.mxu1 %v1911_v21  ;;  %v1927_v29 = vpack.c.bf16 %v257_v28, %v256_v27  ;;  %v129_v32 = vld [vmem:[#allocation7 + $0x58] sm:$0xff]  ;;  %v130_v35 = vld [vmem:[#allocation7 + $0x60] sm:$0xff]  ;;  %v131_v36 = vld [vmem:[#allocation7 + $0x68] sm:$0xff]  ;;  %p1715_p5 = por %p1714_p4, %p1713_p3 }
  0x30   :  { %1568 = vmatprep.subr.bf16.mxu1 %v1787_v15  ;;  %v1547_v34 = vpack.c.bf16 %v129_v32, %v128_v31  ;;  %v259_v37 = vld [vmem:[%s2123_s2] sm:$0xff]  ;;  %v1551_v38 = vpack.c.bf16 %v131_v36, %v130_v35  ;;  %v133_v40 = vld [vmem:[#allocation7 + $0x78] sm:$0xff] }
  0x31   :  { %86 = vperm.xlu1 %1631, %v65_v13   ;;  %83 = vperm.xlu0 %1630, %v64_v14   ;;  %v132_v39 = vld [vmem:[#allocation7 + $0x70] sm:$0xff]  ;;  %v258_v53 = vld [vmem:[#allocation4] sm:$0xff]  ;;  %p1716_p6 = pnand %p1715_p5, %p1709_p2 }
  0x32   :  { %1534 = vmatpush3.bf16.msra.mxu0 %v1531_v10  ;;  %v1555_v41 = vpack.c.bf16 %v133_v40, %v132_v39  ;;  %v1273_v54 = vld [vmem:[%s2126_s5] ss:$0 sm:$0xff]  ;;  %s1792_s5 = smov 64  }
  0x33   :  { %1536 = vmatprep.subr.bf16.mxu0 %v1535_v16  ;;  %1570 = vmatpush3.bf16.msra.mxu1 %v1927_v29 }
  0x34   :  { %1571 = vmatprep.subr.bf16.mxu1 %v1787_v15 }
  0x35   :  { %92 = vperm.xlu1 %1631, %v67_v22   ;;  %89 = vperm.xlu0 %1630, %v66_v23  }
  0x36   :  { %1538 = vmatpush3.bf16.msra.mxu0 %v1535_v16 }
  0x37   :  { %1540 = vmatprep.subr.bf16.mxu0 %v1539_v24 }
  0x39   :  { %340 = vrot.lane.b32.xlu1 %v259_v37, %s1790_s23 }
  0x3a   :  { %1542 = vmatpush3.bf16.msra.mxu0 %v1539_v24 }
  0x3b   :  { %1544 = vmatprep.subr.bf16.mxu0 %v1543_v30 }
  0x3e   :  { %1546 = vmatpush3.bf16.msra.mxu0 %v1543_v30 }
  0x3f   :  { %1548 = vmatprep.subr.bf16.mxu0 %v1547_v34 }
  0x42   :  { %1550 = vmatpush3.bf16.msra.mxu0 %v1547_v34 }
  0x43   :  { %1552 = vmatprep.subr.bf16.mxu0 %v1551_v38 }
  0x46   :  { %1554 = vmatpush3.bf16.msra.mxu0 %v1551_v38 }
  0x47   :  { %1556 = vmatprep.subr.bf16.mxu0 %v1555_v41 }
  0x4a   :  { %1558 = vmatpush3.bf16.msra.mxu0 %v1555_v41 }
  0x4b   :  { %1559 = vmatprep.subr.bf16.mxu0 %v1787_v15 }
  0xa8   :  { %v78_v44 = vpop.permute.xlu1 %77  ;;  %v72_v45 = vpop.permute.xlu0 %71 }
  0xa9   :  { %vm94_vm1 = vcmp.eq.s32.totalorder %v69_v43, %v72_v45  ;;  %vm96_vm2 = vcmp.eq.s32.totalorder %v69_v43, %v78_v44 }
  0xaa   :  { %1407 = vmatprep.mubr.msk.f32.mxu0 %vm94_vm1, %v1791_v46 }
  0xac   :  { %v81_v47 = vpop.permute.xlu1 %80  ;;  %v75_v48 = vpop.permute.xlu0 %74 }
  0xad   :  { %vm95_vm3 = vcmp.eq.s32.totalorder %v69_v43, %v75_v48  ;;  %vm97_vm4 = vcmp.eq.s32.totalorder %v69_v43, %v81_v47 }
  0xae   :  { %1408 = vmatmul.mubr.msk.f32.vlgmr.msra.gmra.mrb[0].mxu0 %vm95_vm3, %v1791_v46 }
  0xaf   :  { %1561 = vmatpush3.bf16.msra.mxu0 %v1911_v21  ;;  %1410 = vmatprep.mubr.msk.f32.mxu0 %vm96_vm2, %v1791_v46 }
  0xb0   :  { %v87_v49 = vpop.permute.xlu1 %86  ;;  %v84_v50 = vpop.permute.xlu0 %83  ;;  %1562 = vmatprep.subr.bf16.mxu0 %v1787_v15 }
  0xb1   :  { %vm98_vm5 = vcmp.eq.s32.totalorder %v69_v43, %v84_v50  ;;  %vm99_vm6 = vcmp.eq.s32.totalorder %v69_v43, %v87_v49 }
  0xb2   :  { %1411 = vmatmul.mubr.msk.f32.gmra.mrb[2].mxu0 %vm97_vm4, %v1791_v46 }
  0xb3   :  { %1413 = vmatprep.mubr.msk.f32.mxu0 %vm98_vm5, %v1791_v46  ;;  %1564 = vmatpush3.bf16.msra.mxu0 %v1927_v29 }
  0xb4   :  { %v90_v51 = vpop.permute.xlu0 %89  ;;  %1589 = vmatprep.subr.bf16.mxu0 %v1787_v15  ;;  %v93_v52 = vpop.permute.xlu1 %92 }
  0xb5   :  { %vm100_vm7 = vcmp.eq.s32.totalorder %v69_v43, %v90_v51  ;;  %vm101_vm8 = vcmp.eq.s32.totalorder %v69_v43, %v93_v52 }
  0xb6   :  { %1414 = vmatmul.mubr.msk.f32.gmra.mrb[4].mxu0 %vm99_vm6, %v1791_v46 }
  0xb7   :  { %1416 = vmatprep.mubr.msk.f32.mxu0 %vm100_vm7, %v1791_v46 }
  0xb8   :  { %v341_v16 = vpop.permute.xlu1 %340 }
  0xba   :  { %1417 = vmatmul.mubr.msk.f32.gmra.mrb[6].mxu0 %vm101_vm8, %v1791_v46 }
  0xbb   :  { %1427 = vmatprep.mubr.msk.f32.mxu0 %vm1788_vm0, %v1789_v33 }
  0xbe   :  { %1428 = vmatmul.mubr.msk.f32.vlgmr.msra.gmra.mrb[8].mxu0 %vm261_vm9, %v258_v53 }
  0xbf   :  { %1591 = vmatpush3.bf16.msra.mxu0 %v1911_v21  ;;  %1482 = vmatprep.mubr.msk.f32.mxu0 %vm1788_vm0, %v1789_v33 }
  0xc0   :  { %1592 = vmatprep.subr.bf16.mxu0 %v1787_v15 }
  0xc3   :  { %1594 = vmatpush3.bf16.msra.mxu0 %v1927_v29 }
  0xc4   :  { %1601 = vmatprep.subr.bf16.mxu0 %v1787_v15 }
 0x181   :  { %v1409_v55 = vpop.f32.mrb[0].mxu0 }
 0x182   :  { %v213_v56 = vadd.f32 %v1409_v55, %v1273_v54  ;;  %v207_v57 = vpop.f32.mrb[1].mxu0 }
 0x183   :  { %v208_v6 = vadd.f32 %v1273_v54, %v207_v57 }
 0x185   :  { %v1412_v58 = vpop.f32.mrb[2].mxu0 }
 0x186   :  { %v1954_v59 = vadd.f32 %v1412_v58, %v1273_v54  ;;  %v217_v60 = vpop.f32.mrb[3].mxu0 }
 0x187   :  { %v1956_v61 = vadd.f32 %v1273_v54, %v217_v60 }
 0x189   :  { %v1415_v62 = vpop.f32.mrb[4].mxu0 }
 0x18a   :  { %v1958_v63 = vadd.f32 %v1415_v62, %v1273_v54  ;;  %v227_v0 = vpop.f32.mrb[5].mxu0 }
 0x18b   :  { %v1960_v1 = vadd.f32 %v1273_v54, %v227_v0 }
 0x18d   :  { %v1418_v2 = vpop.f32.mrb[6].mxu0 }
 0x18e   :  { %v1962_v3 = vadd.f32 %v1418_v2, %v1273_v54  ;;  %v237_v4 = vpop.f32.mrb[7].mxu0 }
 0x18f   :  { %v1964_v5 = vadd.f32 %v1273_v54, %v237_v4 }
 0x191   :  { %v331_v7 = vpop.f32.mrb[8].mxu0 }
 0x192   :  { %v335_v8 = vadd.f32 %v331_v7, %v208_v6  ;;  %v1429_v9 = vpop.f32.mrb[9].mxu0 }
 0x194   :  { %1632 = vtanh.f32 %v335_v8 }
 0x19e   :  { %v1633_v10 = vpop.eup %1632 }
 0x19f   :  { %345 = vrot.lane.b32.xlu0 %v1633_v10, %s1792_s5  ;;  %v337_v11 = vmul.f32 0.5, %v1633_v10 }
 0x1a1   :  { %v338_v12 = vadd.f32 0.5, %v337_v11 }
 0x1a3   :  { %v343_v17 = vmul.f32 %v341_v16, %v338_v12 }
 0x211   :  { %v346_v13 = vpop.permute.xlu0 %345 }
 0x212   :  { %v348_v14 = vmul.f32 %v346_v13, %v338_v12 }
 0x214   :  { %350 = vrot.lane.b32.xlu0 %v348_v14, %s1790_s23 }
 0x286   :  { %v351_v18 = vpop.permute.xlu0 %350 }
 0x287   :  { %v353_v19 = vadd.f32 %v351_v18, %v343_v17 }
 0x289   :  { %1634 = vtanh.f32 %v353_v19 }
 0x293   :  { %v1635_v20 = vpop.eup %1634 }
 0x294   :  { %356 = vrot.lane.b32.xlu1 %v1635_v20, %s1792_s5 }
 0x306   :  { %v357_v22 = vpop.permute.xlu1 %356 }
 0x307   :  { %v359_v23 = vmul.f32 %v357_v22, %v338_v12 }
 0x309   :  { %361 = vrot.lane.b32.xlu0 %v359_v23, %s1790_s23 }
 0x37b   :  { %v362_v24 = vpop.permute.xlu0 %361 }
 0x37c   :  { %364 = vst.msk [vmem:[#allocation3] sm:$0xff] %vm261_vm9, %v362_v24  ;;  %1439 = vmatmul.mubr.msk.f32.vlgmr.msra.gmra.mrb[0].mxu1 %vm261_vm9, %v362_v24 }
 0x37d   :  { %1573 = vmatpush3.bf16.msra.mxu1 %v1911_v21  ;;  %1449 = vmatprep.mubr.msk.f32.mxu1 %vm1788_vm0, %v1789_v33 }
 0x37e   :  { %1574 = vmatprep.subr.bf16.mxu1 %v1787_v15 }
 0x381   :  { %1576 = vmatpush3.bf16.msra.mxu1 %v1927_v29 }
 0x382   :  { %1577 = vmatprep.subr.bf16.mxu1 %v1787_v15 }
 0x44f   :  { %v434_v25 = vpop.f32.mrb[0].mxu1 }
 0x450   :  { %v438_v26 = vadd.f32 %v434_v25, %v213_v56  ;;  %v1440_v27 = vpop.f32.mrb[1].mxu1 }
 0x452   :  { %1636 = vtanh.f32 %v438_v26 }
 0x45c   :  { %v1637_v28 = vpop.eup %1636 }
 0x45d   :  { %444 = vrot.lane.b32.xlu1 %v1637_v28, %s1792_s5  ;;  %v440_v30 = vmul.f32 0.5, %v1637_v28 }
 0x45f   :  { %v441_v31 = vadd.f32 0.5, %v440_v30 }
 0x461   :  { %v442_v35 = vmul.f32 %v441_v31, %v353_v19 }
 0x4cf   :  { %v445_v32 = vpop.permute.xlu1 %444 }
 0x4d0   :  { %v447_v34 = vmul.f32 %v445_v32, %v441_v31 }
 0x4d2   :  { %449 = vrot.lane.b32.xlu0 %v447_v34, %s1790_s23 }
 0x544   :  { %v450_v36 = vpop.permute.xlu0 %449 }
 0x545   :  { %v452_v37 = vadd.f32 %v450_v36, %v442_v35 }
 0x547   :  { %1638 = vtanh.f32 %v452_v37 }
 0x551   :  { %v1639_v38 = vpop.eup %1638 }
 0x552   :  { %455 = vrot.lane.b32.xlu1 %v1639_v38, %s1792_s5 }
 0x5c4   :  { %v456_v39 = vpop.permute.xlu1 %455 }
 0x5c5   :  { %v458_v40 = vmul.f32 %v456_v39, %v441_v31 }
 0x5c7   :  { %460 = vrot.lane.b32.xlu0 %v458_v40, %s1790_s23 }
 0x639   :  { %v461_v41 = vpop.permute.xlu0 %460 }
 0x63a   :  { %463 = vst.msk [vmem:[#allocation3 + $0x8] sm:$0xff] %vm261_vm9, %v461_v41  ;;  %1450 = vmatmul.mubr.msk.f32.vlgmr.msra.gmra.mrb[2].mxu1 %vm261_vm9, %v461_v41 }
 0x63b   :  { %1579 = vmatpush3.bf16.msra.mxu1 %v1911_v21  ;;  %1460 = vmatprep.mubr.msk.f32.mxu1 %vm1788_vm0, %v1789_v33 }
 0x63c   :  { %1580 = vmatprep.subr.bf16.mxu1 %v1787_v15 }
 0x63f   :  { %1582 = vmatpush3.bf16.msra.mxu1 %v1927_v29 }
 0x640   :  { %1583 = vmatprep.subr.bf16.mxu1 %v1787_v15 }
 0x70d   :  { %v533_v42 = vpop.f32.mrb[2].mxu1 }
 0x70e   :  { %v537_v43 = vadd.f32 %v533_v42, %v1956_v61  ;;  %v1451_v44 = vpop.f32.mrb[3].mxu1  ;;  %v1074_v42 = vld [vmem:[%s2127_s6 + $0x10] sm:$0xff] }
 0x710   :  { %1640 = vtanh.f32 %v537_v43  ;;  %v1075_v43 = vld [vmem:[%s2127_s6 + $0x18] sm:$0xff] }
 0x711   :  { %v1611_v44 = vpack.c.bf16 %v1075_v43, %v1074_v42 }
 0x71a   :  { %v1641_v45 = vpop.eup %1640 }
 0x71b   :  { %543 = vrot.lane.b32.xlu1 %v1641_v45, %s1792_s5  ;;  %v539_v46 = vmul.f32 0.5, %v1641_v45 }
 0x71d   :  { %v540_v47 = vadd.f32 0.5, %v539_v46  ;;  %v1064_v46 = vld [vmem:[#allocation3] sm:$0xff] }
 0x71f   :  { %v541_v50 = vmul.f32 %v540_v47, %v452_v37 }
 0x78d   :  { %v544_v48 = vpop.permute.xlu1 %543 }
 0x78e   :  { %v546_v49 = vmul.f32 %v544_v48, %v540_v47 }
 0x790   :  { %548 = vrot.lane.b32.xlu0 %v546_v49, %s1790_s23 }
 0x802   :  { %v549_v51 = vpop.permute.xlu0 %548 }
 0x803   :  { %v551_v52 = vadd.f32 %v549_v51, %v541_v50 }
 0x805   :  { %1642 = vtanh.f32 %v551_v52 }
 0x80f   :  { %v1643_v53 = vpop.eup %1642 }
 0x810   :  { %554 = vrot.lane.b32.xlu1 %v1643_v53, %s1792_s5 }
 0x882   :  { %v555_v54 = vpop.permute.xlu1 %554 }
 0x883   :  { %v557_v55 = vmul.f32 %v555_v54, %v540_v47  ;;  %v1065_v47 = vld [vmem:[#allocation3 + $0x8] sm:$0xff] }
 0x885   :  { %559 = vrot.lane.b32.xlu0 %v557_v55, %s1790_s23  ;;  %v2056_v55 = vld [vmem:[%s2128_s7] ss:$0 sm:$0xff]  ;;  %s1793_s7 = smov 96  }
 0x8f7   :  { %v560_v56 = vpop.permute.xlu0 %559 }
 0x8f8   :  { %562 = vst.msk [vmem:[#allocation3 + $0x10] sm:$0xff] %vm261_vm9, %v560_v56  ;;  %1461 = vmatmul.mubr.msk.f32.vlgmr.msra.gmra.mrb[4].mxu1 %vm261_vm9, %v560_v56 }
 0x8f9   :  { %1585 = vmatpush3.bf16.msra.mxu1 %v1911_v21  ;;  %1471 = vmatprep.mubr.msk.f32.mxu1 %vm1788_vm0, %v1789_v33 }
 0x8fa   :  { %1586 = vmatprep.subr.bf16.mxu1 %v1787_v15 }
 0x8fd   :  { %1588 = vmatpush3.bf16.msra.mxu1 %v1927_v29 }
 0x8fe   :  { %1595 = vmatprep.subr.bf16.mxu1 %v1787_v15 }
 0x8ff   :  { %v1066_v48 = vld [vmem:[#allocation3 + $0x10] sm:$0xff] }
 0x9cb   :  { %v632_v57 = vpop.f32.mrb[4].mxu1 }
 0x9cc   :  { %v636_v58 = vadd.f32 %v632_v57, %v1954_v59  ;;  %v1462_v60 = vpop.f32.mrb[5].mxu1 }
 0x9ce   :  { %1644 = vtanh.f32 %v636_v58 }
 0x9d8   :  { %v1645_v61 = vpop.eup %1644 }
 0x9d9   :  { %642 = vrot.lane.b32.xlu1 %v1645_v61, %s1792_s5  ;;  %v638_v62 = vmul.f32 0.5, %v1645_v61 }
 0x9db   :  { %v639_v0 = vadd.f32 0.5, %v638_v62 }
 0x9dd   :  { %v640_v6 = vmul.f32 %v639_v0, %v551_v52 }
 0xa4b   :  { %v643_v2 = vpop.permute.xlu1 %642 }
 0xa4c   :  { %v645_v4 = vmul.f32 %v643_v2, %v639_v0 }
 0xa4e   :  { %647 = vrot.lane.b32.xlu0 %v645_v4, %s1790_s23 }
 0xac0   :  { %v648_v7 = vpop.permute.xlu0 %647 }
 0xac1   :  { %v650_v8 = vadd.f32 %v648_v7, %v640_v6 }
 0xac3   :  { %1646 = vtanh.f32 %v650_v8 }
 0xacd   :  { %v1647_v9 = vpop.eup %1646 }
 0xace   :  { %653 = vrot.lane.b32.xlu1 %v1647_v9, %s1792_s5 }
 0xb40   :  { %v654_v10 = vpop.permute.xlu1 %653 }
 0xb41   :  { %v656_v59 = vmul.f32 %v654_v10, %v639_v0 }
 0xb43   :  { %658 = vrot.lane.b32.xlu0 %v656_v59, %s1790_s23 }
 0xbb5   :  { %v659_v11 = vpop.permute.xlu0 %658 }
 0xbb6   :  { %661 = vst.msk [vmem:[#allocation3 + $0x18] sm:$0xff] %vm261_vm9, %v659_v11  ;;  %1472 = vmatmul.mubr.msk.f32.vlgmr.msra.gmra.mrb[6].mxu1 %vm261_vm9, %v659_v11 }
 0xbb7   :  { %1597 = vmatpush3.bf16.msra.mxu1 %v1911_v21  ;;  %1493 = vmatprep.mubr.msk.f32.mxu1 %vm1788_vm0, %v1789_v33 }
 0xbb8   :  { %1598 = vmatprep.subr.bf16.mxu1 %v1787_v15 }
 0xbbb   :  { %1600 = vmatpush3.bf16.msra.mxu1 %v1927_v29 }
 0xbbd   :  { %v1067_v49 = vld [vmem:[#allocation3 + $0x18] sm:$0xff] }
 0xc89   :  { %v731_v12 = vpop.f32.mrb[6].mxu1 }
 0xc8a   :  { %v735_v13 = vadd.f32 %v731_v12, %v1960_v1  ;;  %v1473_v14 = vpop.f32.mrb[7].mxu1 }
 0xc8c   :  { %1648 = vtanh.f32 %v735_v13 }
 0xc96   :  { %v1649_v16 = vpop.eup %1648 }
 0xc97   :  { %741 = vrot.lane.b32.xlu1 %v1649_v16, %s1792_s5  ;;  %v737_v17 = vmul.f32 0.5, %v1649_v16 }
 0xc99   :  { %v738_v18 = vadd.f32 0.5, %v737_v17 }
 0xc9b   :  { %v739_v22 = vmul.f32 %v738_v18, %v650_v8 }
 0xd09   :  { %v742_v19 = vpop.permute.xlu1 %741 }
 0xd0a   :  { %v744_v20 = vmul.f32 %v742_v19, %v738_v18 }
 0xd0c   :  { %746 = vrot.lane.b32.xlu0 %v744_v20, %s1790_s23 }
 0xd7e   :  { %v747_v23 = vpop.permute.xlu0 %746 }
 0xd7f   :  { %v749_v24 = vadd.f32 %v747_v23, %v739_v22 }
 0xd81   :  { %1650 = vtanh.f32 %v749_v24 }
 0xd8b   :  { %v1651_v25 = vpop.eup %1650 }
 0xd8c   :  { %752 = vrot.lane.b32.xlu1 %v1651_v25, %s1792_s5 }
 0xdfe   :  { %v753_v26 = vpop.permute.xlu1 %752 }
 0xdff   :  { %v755_v1 = vmul.f32 %v753_v26, %v738_v18 }
 0xe01   :  { %757 = vrot.lane.b32.xlu0 %v755_v1, %s1790_s23 }
 0xe73   :  { %v758_v27 = vpop.permute.xlu0 %757 }
 0xe74   :  { %760 = vst.msk [vmem:[#allocation3 + $0x20] sm:$0xff] %vm261_vm9, %v758_v27  ;;  %1483 = vmatmul.mubr.msk.f32.vlgmr.msra.gmra.mrb[10].mxu0 %vm261_vm9, %v758_v27 }
 0xe75   :  { %1603 = vmatpush3.bf16.msra.mxu0 %v1911_v21  ;;  %1504 = vmatprep.mubr.msk.f32.mxu0 %vm1788_vm0, %v1789_v33 }
 0xe76   :  { %1604 = vmatprep.subr.bf16.mxu0 %v1787_v15  ;;  %v1072_v15 = vld [vmem:[%s2127_s6] sm:$0xff] }
 0xe79   :  { %1606 = vmatpush3.bf16.msra.mxu0 %v1927_v29  ;;  %v1073_v29 = vld [vmem:[%s2127_s6 + $0x8] sm:$0xff] }
 0xe7b   :  { %v1068_v50 = vld [vmem:[#allocation3 + $0x20] sm:$0xff] }
 0xf47   :  { %v830_v28 = vpop.f32.mrb[10].mxu0 }
 0xf48   :  { %v834_v30 = vadd.f32 %v830_v28, %v1958_v63  ;;  %v1484_v31 = vpop.f32.mrb[11].mxu0  ;;  %v1607_v63 = vpack.c.bf16 %v1073_v29, %v1072_v15 }
 0xf4a   :  { %1652 = vtanh.f32 %v834_v30  ;;  %1608 = vmatprep.subr.bf16.mxu1 %v1607_v63 }
 0xf54   :  { %v1653_v32 = vpop.eup %1652 }
 0xf55   :  { %840 = vrot.lane.b32.xlu1 %v1653_v32, %s1792_s5  ;;  %v836_v34 = vmul.f32 0.5, %v1653_v32 }
 0xf57   :  { %v837_v35 = vadd.f32 0.5, %v836_v34 }
 0xf59   :  { %v838_v21 = vmul.f32 %v837_v35, %v749_v24 }
 0xfc7   :  { %v841_v36 = vpop.permute.xlu1 %840 }
 0xfc8   :  { %v843_v37 = vmul.f32 %v841_v36, %v837_v35 }
 0xfca   :  { %845 = vrot.lane.b32.xlu0 %v843_v37, %s1790_s23 }
0x103c   :  { %v846_v33 = vpop.permute.xlu0 %845 }
0x103d   :  { %v848_v38 = vadd.f32 %v846_v33, %v838_v21 }
0x103f   :  { %1654 = vtanh.f32 %v848_v38 }
0x1049   :  { %v1655_v39 = vpop.eup %1654 }
0x104a   :  { %851 = vrot.lane.b32.xlu1 %v1655_v39, %s1792_s5 }
0x10bc   :  { %v852_v40 = vpop.permute.xlu1 %851 }
0x10bd   :  { %v854_v41 = vmul.f32 %v852_v40, %v837_v35 }
0x10bf   :  { %856 = vrot.lane.b32.xlu0 %v854_v41, %s1790_s23 }
0x1131   :  { %v857_v45 = vpop.permute.xlu0 %856 }
0x1132   :  { %859 = vst.msk [vmem:[#allocation3 + $0x28] sm:$0xff] %vm261_vm9, %v857_v45  ;;  %1494 = vmatmul.mubr.msk.f32.vlgmr.msra.gmra.mrb[8].mxu1 %vm261_vm9, %v857_v45 }
0x1133   :  { %1610 = vmatpush3.bf16.msra.mxu1 %v1607_v63  ;;  %1515 = vmatprep.mubr.msk.f32.mxu1 %vm261_vm9, %v1064_v46 }
0x1134   :  { %1612 = vmatprep.subr.bf16.mxu1 %v1611_v44 }
0x1137   :  { %1614 = vmatpush3.bf16.msra.mxu1 %v1611_v44 }
0x1139   :  { %v1069_v51 = vld [vmem:[#allocation3 + $0x28] sm:$0xff] }
0x113a   :  { %1516 = vmatmul.mubr.msk.f32.vlgmr.msra.gmra.mrb[10].mxu1 %vm261_vm9, %v1065_v47 }
0x113b   :  { %1518 = vmatprep.mubr.msk.f32.mxu1 %vm261_vm9, %v1066_v48 }
0x113e   :  { %1519 = vmatmul.mubr.msk.f32.gmra.mrb[12].mxu1 %vm261_vm9, %v1067_v49 }
0x113f   :  { %1521 = vmatprep.mubr.msk.f32.mxu1 %vm261_vm9, %v1068_v50 }
0x1142   :  { %1522 = vmatmul.mubr.msk.f32.gmra.mrb[14].mxu1 %vm261_vm9, %v1069_v51 }
0x1205   :  { %v929_v52 = vpop.f32.mrb[8].mxu1 }
0x1206   :  { %v933_v53 = vadd.f32 %v929_v52, %v1964_v5  ;;  %v1495_v54 = vpop.f32.mrb[9].mxu1 }
0x1208   :  { %1656 = vtanh.f32 %v933_v53 }
0x120d   :  { %v1517_v56 = vpop.f32.mrb[10].mxu1 }
0x120e   :  { %v1179_v57 = vadd.f32 %v1517_v56, %v2056_v55  ;;  %v1173_v58 = vpop.f32.mrb[11].mxu1 }
0x120f   :  { %v1174_v60 = vadd.f32 %v2056_v55, %v1173_v58 }
0x1210   :  { %1213 = vst [vmem:[#allocation9 + $0x8] sm:$0xff] %v1179_v57 }
0x1211   :  { %1212 = vst [vmem:[#allocation9] sm:$0xff] %v1174_v60  ;;  %v1520_v61 = vpop.f32.mrb[12].mxu1 }
0x1212   :  { %v1657_v62 = vpop.eup %1656  ;;  %v1189_v0 = vadd.f32 %v1520_v61, %v2056_v55  ;;  %v1183_v5 = vpop.f32.mrb[13].mxu1 }
0x1213   :  { %v1184_v2 = vadd.f32 %v2056_v55, %v1183_v5  ;;  %939 = vrot.lane.b32.xlu1 %v1657_v62, %s1792_s5  ;;  %v935_v9 = vmul.f32 0.5, %v1657_v62 }
0x1214   :  { %1215 = vst [vmem:[#allocation9 + $0x18] sm:$0xff] %v1189_v0 }
0x1215   :  { %1214 = vst [vmem:[#allocation9 + $0x10] sm:$0xff] %v1184_v2  ;;  %v1523_v4 = vpop.f32.mrb[14].mxu1  ;;  %v936_v10 = vadd.f32 0.5, %v935_v9 }
0x1216   :  { %v1199_v6 = vadd.f32 %v1523_v4, %v2056_v55  ;;  %v1193_v7 = vpop.f32.mrb[15].mxu1 }
0x1217   :  { %v1194_v8 = vadd.f32 %v2056_v55, %v1193_v7  ;;  %v937_v12 = vmul.f32 %v936_v10, %v848_v38 }
0x1218   :  { %1217 = vst [vmem:[#allocation9 + $0x28] sm:$0xff] %v1199_v6 }
0x1219   :  { %1216 = vst [vmem:[#allocation9 + $0x20] sm:$0xff] %v1194_v8 }
0x1285   :  { %v940_v59 = vpop.permute.xlu1 %939 }
0x1286   :  { %v942_v11 = vmul.f32 %v940_v59, %v936_v10 }
0x1288   :  { %944 = vrot.lane.b32.xlu0 %v942_v11, %s1790_s23 }
0x12fa   :  { %v945_v13 = vpop.permute.xlu0 %944 }
0x12fb   :  { %v947_v14 = vadd.f32 %v945_v13, %v937_v12 }
0x12fd   :  { %1658 = vtanh.f32 %v947_v14 }
0x1307   :  { %v1659_v16 = vpop.eup %1658 }
0x1308   :  { %950 = vrot.lane.b32.xlu1 %v1659_v16, %s1792_s5 }
0x137a   :  { %v951_v17 = vpop.permute.xlu1 %950 }
0x137b   :  { %v953_v18 = vmul.f32 %v951_v17, %v936_v10 }
0x137d   :  { %955 = vrot.lane.b32.xlu0 %v953_v18, %s1790_s23 }
0x13ef   :  { %v956_v19 = vpop.permute.xlu0 %955 }
0x13f0   :  { %958 = vst.msk [vmem:[#allocation3 + $0x30] sm:$0xff] %vm261_vm9, %v956_v19  ;;  %1505 = vmatmul.mubr.msk.f32.vlgmr.msra.gmra.mrb[12].mxu0 %vm261_vm9, %v956_v19 }
0x13f7   :  { %v1070_v20 = vld [vmem:[#allocation3 + $0x30] sm:$0xff] }
0x13f8   :  { %1524 = vmatprep.mubr.msk.f32.mxu1 %vm261_vm9, %v1070_v20 }
0x14c3   :  { %v1028_v22 = vpop.f32.mrb[12].mxu0 }
0x14c4   :  { %v1032_v23 = vadd.f32 %v1028_v22, %v1962_v3  ;;  %v1506_v24 = vpop.f32.mrb[13].mxu0 }
0x14c6   :  { %1660 = vtanh.f32 %v1032_v23 }
0x14d0   :  { %v1661_v25 = vpop.eup %1660 }
0x14d1   :  { %1038 = vrot.lane.b32.xlu1 %v1661_v25, %s1792_s5  ;;  %v1034_v26 = vmul.f32 0.5, %v1661_v25 }
0x14d3   :  { %v1035_v1 = vadd.f32 0.5, %v1034_v26 }
0x14d5   :  { %v1036_v30 = vmul.f32 %v1035_v1, %v947_v14 }
0x1543   :  { %v1039_v27 = vpop.permute.xlu1 %1038 }
0x1544   :  { %v1041_v28 = vmul.f32 %v1039_v27, %v1035_v1 }
0x1546   :  { %1043 = vrot.lane.b32.xlu0 %v1041_v28, %s1790_s23 }
0x15b8   :  { %v1044_v31 = vpop.permute.xlu0 %1043 }
0x15b9   :  { %v1046_v32 = vadd.f32 %v1044_v31, %v1036_v30 }
0x15bb   :  { %1662 = vtanh.f32 %v1046_v32 }
0x15c5   :  { %v1663_v34 = vpop.eup %1662 }
0x15c6   :  { %1049 = vrot.lane.b32.xlu1 %v1663_v34, %s1792_s5 }
0x15ca   :  { %1060 = vrot.lane.b32.xlu1 %v1046_v32, %s1793_s7 }
0x1638   :  { %v1050_v3 = vpop.permute.xlu1 %1049 }
0x1639   :  { %v1052_v35 = vmul.f32 %v1050_v3, %v1035_v1 }
0x163b   :  { %1054 = vrot.lane.b32.xlu0 %v1052_v35, %s1790_s23 }
0x163c   :  { %v1061_v36 = vpop.permute.xlu1 %1060 }
0x163d   :  { %1063 = vst.msk [vmem:[#allocation12] sm:$0xff] %vm261_vm9, %v1061_v36 }
0x16ad   :  { %v1055_v37 = vpop.permute.xlu0 %1054 }
0x16ae   :  { %1057 = vst.msk [vmem:[#allocation3 + $0x38] sm:$0xff] %vm261_vm9, %v1055_v37  ;;  %1058 = vst.msk [vmem:[#allocation10] sm:$0xff] %vm261_vm9, %v1055_v37 }
0x16b5   :  { %v1071_v21 = vld [vmem:[#allocation3 + $0x38] sm:$0xff] }
0x16b6   :  { %1525 = vmatmul.mubr.msk.f32.gmra.mrb[16].mxu1 %vm261_vm9, %v1071_v21 }
0x16b7   :  { %1719 = shalt.err (!%p1716_p6)
}
0x16b8   :  { %s1720_s19 = scalar_lea.hbm %s2130_s9, 128 }
0x16b9   :  { %p1721_p7 = scmp.ne.s32.totalorder %s2130_s9, %s1720_s19  ;;  %p1724_p8 = scmp.lt.u32.totalorder %s1720_s19, %s2130_s9 }
0x16bb   :  { %p1726_p9 = pnand %p1724_p8, %p1721_p7 }
0x16bd   :  { %1729 = shalt.err (!%p1726_p9)
}
0x16be   :  { %1241 = dma.vmem_to_hbm [thread:$0]  %s1239_s13, 128, %s2130_s9, [#allocation11]  }
0x16bf   :  { %s1795_s2 = smov [#allocation12]  }
0x16c0   :  { %s1248_s24 = sshll.u32 %s1795_s2, 4  ;;  %s1249_s24 = int_to_ptr.vmem [resolvable:$true] %s1248_s24 }
0x16c1   :  { %s1730_s5 = scalar_lea.vmem %s1249_s24, 128  ;;  %p1735_p11 = scmp.lt.s32.totalorder %s1249_s24, %s1249_s24 }
0x16c2   :  { %p1731_p10 = scmp.ne.s32.totalorder %s1249_s24, %s1730_s5  ;;  %p1736_p12 = scmp.lt.s32.totalorder %s1730_s5, %s1730_s5 }
0x16c4   :  { %p1737_p13 = por %p1736_p12, %p1735_p11 }
0x16c6   :  { %p1738_p0 = pnand %p1737_p13, %p1731_p10 }
0x16c8   :  { %1741 = shalt.err (!%p1738_p0)
}
0x16c9   :  { %s1742_s25 = scalar_lea.hbm %s2131_s10, 128 }
0x16ca   :  { %p1743_p1 = scmp.ne.s32.totalorder %s2131_s10, %s1742_s25  ;;  %p1746_p2 = scmp.lt.u32.totalorder %s1742_s25, %s2131_s10 }
0x16cc   :  { %p1748_p3 = pnand %p1746_p2, %p1743_p1 }
0x16ce   :  { %1751 = shalt.err (!%p1748_p3)
}
0x16cf   :  { %1251 = dma.vmem_to_hbm [thread:$0]  %s1249_s24, 128, %s2131_s10, [#allocation11]  }
0x16d0   :  { %s1796_s6 = smov [#allocation9]  }
0x16d1   :  { %s1225_s11 = sshll.u32 %s1796_s6, 4  ;;  %s1226_s11 = int_to_ptr.vmem [resolvable:$true] %s1225_s11 }
0x16d2   :  { %s1752_s7 = scalar_lea.vmem %s1226_s11, 1024  ;;  %p1757_p5 = scmp.lt.s32.totalorder %s1226_s11, %s1226_s11 }
0x16d3   :  { %p1753_p4 = scmp.ne.s32.totalorder %s1226_s11, %s1752_s7  ;;  %p1758_p6 = scmp.lt.s32.totalorder %s1752_s7, %s1752_s7 }
0x16d5   :  { %p1759_p7 = por %p1758_p6, %p1757_p5 }
0x16d7   :  { %p1760_p8 = pnand %p1759_p7, %p1753_p4 }
0x1789   :  { %v1526_v33 = vpop.f32.mrb[16].mxu1 }
0x178a   :  { %v1209_v38 = vadd.f32 %v1526_v33, %v2056_v55  ;;  %v1203_v15 = vpop.f32.mrb[17].mxu1 }
0x178b   :  { %v1204_v29 = vadd.f32 %v2056_v55, %v1203_v15 }
0x178c   :  { %1219 = vst [vmem:[#allocation9 + $0x38] sm:$0xff] %v1209_v38 }
0x178d   :  { %1218 = vst [vmem:[#allocation9 + $0x30] sm:$0xff] %v1204_v29 }
0x178e   :  { %1763 = shalt.err (!%p1760_p8)
}
0x178f   :  { %s1764_s13 = scalar_lea.hbm %s2129_s8, 1024 }
0x1790   :  { %p1765_p9 = scmp.ne.s32.totalorder %s2129_s8, %s1764_s13  ;;  %p1768_p10 = scmp.lt.u32.totalorder %s1764_s13, %s2129_s8 }
0x1792   :  { %p1770_p11 = pnand %p1768_p10, %p1765_p9 }
0x1794   :  { %1773 = shalt.err (!%p1770_p11)
}
0x1795   :  { %1231 = dma.vmem_to_hbm [thread:$0]  %s1226_s11, 1024, %s2129_s8, [#allocation6], %s1784_s1, %s1784_s1, %s1785_s14  }
0x1796   :  { %1778 = dma.done.wait [#allocation6], 1024  }
0x1797   :  { %1779 = vsyncadd [#allocation6], 4294966272 }
0x1798   :  { %1780 = dma.done.wait [#allocation11], 256  }
0x1799   :  { %1781 = vsyncadd [#allocation11], 4294967040 }
0x179a   :  { %1261 = vsyncpa [#allocation5], 1 }
0x179b   :  { %1262 = vsyncpa [#allocation8], 1 }
0x179c   :  { %1263 = vsyncpa [#allocation6], 1 }
0x179d   :  { %1264 = vsyncpa [#allocation11], 1 }

</bundles_post_ra>
